<compile_context>
chip_gen: v7x
topology: tpu7x:2x2x1
jax: 0.10.0
libtpu: 0.0.40
codegen_flags: <defaults>
</compile_context>

<pallas_src>
import jax
import jax.numpy as jnp
from jax.experimental import pallas as pl
from jax.experimental.pallas import tpu as pltpu

# ----------------------------- model hyper-params (small synthetic config) ---
B = 16           # batch (multiple of the 8-row batch tile)
BT = 8           # batch tile = rows per grid step (full sublanes)
C = 4            # EEG channels          (config['num_channels'])
T = 64           # time samples
FS = 32          # sampling rate          (config['sampling_rate'])
KT = FS // 4     # temporal conv kernel = 8
F = 8            # temporal/spatial filters
POOL_K = 8       # avg-pool kernel (time)
POOL_S = 4       # avg-pool stride (time)
T1 = T - KT + 1                       # 57  (valid temporal conv)
P = (T1 - POOL_K) // POOL_S + 1       # 13  pooled time steps
EEG_DIM = F * P                       # 104 = eeg_encoder.calculate_output_dim()
EMB = 16         # embedding_dimension
NUM_SUBJECTS = 9
NUM_CLASSES = 4
BN_EPS = 1e-5
CT = C * T       # 256  flattened (channel, time) input width
FT1 = F * T1     # 456  conv output width, columns ordered (filter, time)
FP = F * P       # 104  pooled width, columns ordered (filter, pool) == EEG_DIM


# --------------------------------------------------------------- the kernel --
def _elu(x):
    # exp argument clamped at 0 so the untaken positive branch cannot overflow.
    return jnp.where(x > 0, x, jnp.exp(jnp.minimum(x, 0.0)) - 1.0)


def attn_conditioned_kernel(x_ref, convw_ref, pool_ref, redw_ref, subj_ref,
                            clsw_ref, out_ref):
    # --- temporal conv + spatial conv + BatchNorm, folded into ONE matmul ---
    # convw slab = [ W_toeplitz (CT, F*T1) ; bias row (1, F*T1) ]
    bn = (jnp.dot(x_ref[...], convw_ref[:CT, :],
                  preferred_element_type=jnp.float32)
          + convw_ref[CT:CT + 1, :])                       # (BT, F*T1)

    # --- square non-linearity ------------------------------------------------
    sq = bn * bn

    # --- avg-pool over time as one matmul (block-diagonal pool matrix) -------
    pooled = jnp.dot(sq, pool_ref[...],
                     preferred_element_type=jnp.float32)   # (BT, F*P)

    # --- log + eeg ELU + Linear(EEG_DIM -> EMB) -------------------------------
    # NOTE: matches the module: no clamp before log (pooled > 0 almost surely).
    feat = _elu(jnp.log(pooled))
    red = (jnp.dot(feat, redw_ref[:FP, :],
                   preferred_element_type=jnp.float32)
           + redw_ref[FP:FP + 1, :])                       # (BT, EMB)

    # --- subject conditioning: sigmoid gate (EUP reciprocal), mul, ELU --------
    gate = pl.reciprocal(1.0 + jnp.exp(-subj_ref[...]), approx=True)
    comb = _elu(gate * red)
    # dropout: identity in inference

    # --- classifier ------------------------------------------------------------
    out_ref[...] = (jnp.dot(comb, clsw_ref[:EMB, :],
                            preferred_element_type=jnp.float32)
                    + clsw_ref[EMB:EMB + 1, :])            # (BT, NUM_CLASSES)


# ------------------------------------------------------------- host packing --
def _pack_operands(eeg_data, subject_id, p):
    """Weight folding + slab packing (layout/precompute only, done once)."""
    scale = (p["gamma"] / jnp.sqrt(p["var"] + BN_EPS))[0]          # (F,)
    shift = (p["beta"][0] - p["mu"][0] * scale)                    # (F,)

    # Combined temporal*spatial conv weight with BN scale folded in:
    #   w_comb[c, k, f] = ws[f, c] * wt[f, k] * scale[f]
    w_comb = jnp.einsum("fc,fk->ckf", p["ws"], p["wt"]) * scale[None, None, :]

    # Toeplitz expansion over time: W[(c, t_in), (f, t_out)] = w_comb[c, t_in - t_out, f]
    k_idx = jnp.arange(T)[:, None] - jnp.arange(T1)[None, :]       # (T, T1)
    valid = (k_idx >= 0) & (k_idx < KT)
    w_g = w_comb[:, jnp.clip(k_idx, 0, KT - 1), :]                 # (C, T, T1, F)
    w_g = jnp.where(valid[None, :, :, None], w_g, 0.0)
    w_toe = jnp.transpose(w_g, (0, 1, 3, 2)).reshape(CT, FT1)      # rows (c,t), cols (f,t')

    # conv1 bias goes through the spatial conv and BN:  b = bt * sum_c ws
    b_eff = (p["bt"][0] * jnp.sum(p["ws"], axis=1)) * scale + shift        # (F,)
    b_row = jnp.broadcast_to(b_eff[:, None], (F, T1)).reshape(1, FT1)
    conv_slab = jnp.concatenate([w_toe, b_row], axis=0)            # (CT+1, FT1)

    # Block-diagonal (per-filter) average-pool matrix.
    t = jnp.arange(T1)[:, None]
    pp = jnp.arange(P)[None, :]
    win = ((t >= pp * POOL_S) & (t < pp * POOL_S + POOL_K)).astype(jnp.float32) / POOL_K
    pool_bd = (jnp.eye(F, dtype=jnp.float32)[:, None, :, None]
               * win[None, :, None, :]).reshape(FT1, FP)           # rows (f,t), cols (f,p)

    # Linear(EEG_DIM -> EMB): flatten order (F, P) f-major matches pooled columns.
    red_slab = jnp.concatenate([p["wr"].reshape(FP, EMB), p["br"]], axis=0)   # (FP+1, EMB)
    cls_slab = jnp.concatenate([p["wc"], p["bc"]], axis=0)                    # (EMB+1, NC)

    # nn.Embedding lookup (scalar gather) is glue, done in host JAX.
    subj_feats = p["emb"][subject_id]                              # (B, EMB)
    x_flat = eeg_data.astype(jnp.float32).reshape(eeg_data.shape[0], CT)
    return x_flat, conv_slab, pool_bd, red_slab, subj_feats, cls_slab


# ------------------------------------------------------------------ wrapper --
def attn_conditioned_forward(eeg_data, subject_id, params):
    x_flat, conv_slab, pool_bd, red_slab, subj, cls_slab = _pack_operands(
        eeg_data, subject_id, params)
    b = x_flat.shape[0]
    assert b % BT == 0

    grid_spec = pltpu.PrefetchScalarGridSpec(
        num_scalar_prefetch=0,
        grid=(b // BT,),
        in_specs=[
            pl.BlockSpec((BT, CT), lambda i: (i, 0)),             # EEG rows, per tile
            pl.BlockSpec((CT + 1, FT1), lambda i: (0, 0)),        # shared slabs: fetched
            pl.BlockSpec((FT1, FP), lambda i: (0, 0)),            #   once, held resident
            pl.BlockSpec((FP + 1, EMB), lambda i: (0, 0)),
            pl.BlockSpec((BT, EMB), lambda i: (i, 0)),            # subject feats, per tile
            pl.BlockSpec((EMB + 1, NUM_CLASSES), lambda i: (0, 0)),
        ],
        out_specs=pl.BlockSpec((BT, NUM_CLASSES), lambda i: (i, 0)),
    )
    return pl.pallas_call(
        attn_conditioned_kernel,
        out_shape=jax.ShapeDtypeStruct((b, NUM_CLASSES), jnp.float32),
        grid_spec=grid_spec,
        compiler_params=pltpu.CompilerParams(
            dimension_semantics=("parallel",)),   # batch tiles -> both TCs on v7x
    )(x_flat, conv_slab, pool_bd, red_slab, subj, cls_slab)


# ------------------------------------------------------- pure-JAX reference --
def reference_forward(eeg_data, subject_id, p):
    x = eeg_data.astype(jnp.float32)
    b = x.shape[0]
    temp = jnp.zeros((b, F, C, T1), jnp.float32)
    for k in range(KT):
        temp = temp + p["wt"][None, :, k:k + 1, None] * x[:, None, :, k:k + T1]
    temp = temp + p["bt"][:, :, None, None]
    spat = jnp.sum(temp * p["ws"][None, :, :, None], axis=2)
    bn = ((spat - p["mu"][:, :, None]) / jnp.sqrt(p["var"][:, :, None] + BN_EPS)
          * p["gamma"][:, :, None] + p["beta"][:, :, None])
    sq = bn * bn
    pooled = jnp.stack(
        [jnp.mean(sq[:, :, i * POOL_S:i * POOL_S + POOL_K], axis=2)
         for i in range(P)], axis=2)                           # (B, F, P)
    feat = _elu(jnp.log(pooled))
    red = jnp.einsum("bfp,fpe->be", feat, p["wr"]) + p["br"]
    gate = 1.0 / (1.0 + jnp.exp(-p["emb"][subject_id]))
    comb = _elu(gate * red)
    return comb @ p["wc"] + p["bc"]


# --------------------------------------------------------------------- main --
def make_params(key):
    ks = jax.random.split(key, 12)
    return {
        "wt": 0.3 * jax.random.normal(ks[0], (F, KT), jnp.float32),
        "bt": 0.1 * jax.random.normal(ks[1], (1, F), jnp.float32),
        "ws": 0.3 * jax.random.normal(ks[2], (F, C), jnp.float32),
        "gamma": 1.0 + 0.1 * jax.random.normal(ks[3], (1, F), jnp.float32),
        "beta": 0.1 * jax.random.normal(ks[4], (1, F), jnp.float32),
        "mu": 0.1 * jax.random.normal(ks[5], (1, F), jnp.float32),
        "var": 0.5 + jnp.abs(jax.random.normal(ks[6], (1, F), jnp.float32)),
        # Linear(EEG_DIM, EMB) weight stored as (F, P, EMB) (PyTorch flatten order).
        "wr": 0.1 * jax.random.normal(ks[7], (F, P, EMB), jnp.float32),
        "br": 0.1 * jax.random.normal(ks[8], (1, EMB), jnp.float32),
        "emb": jax.random.normal(ks[9], (NUM_SUBJECTS, EMB), jnp.float32),
        "wc": 0.2 * jax.random.normal(ks[10], (EMB, NUM_CLASSES), jnp.float32),
        "bc": 0.1 * jax.random.normal(ks[11], (1, NUM_CLASSES), jnp.float32),
    }


if __name__ == "__main__":
    key = jax.random.PRNGKey(0)
    kx, kid, kp = jax.random.split(key, 3)

    eeg_data = jax.random.normal(kx, (B, C, T), jnp.float32)
    subject_id = jax.random.randint(kid, (B,), 0, NUM_SUBJECTS, jnp.int32)
    params = make_params(kp)

    out = jax.block_until_ready(attn_conditioned_forward(eeg_data, subject_id, params))
    ref = jax.block_until_ready(reference_forward(eeg_data, subject_id, params))

    assert out.shape == (B, NUM_CLASSES)
    # 2e-3 tolerance: kernel uses the EUP approximate reciprocal for the sigmoid gate.
    assert jnp.allclose(out, ref, atol=2e-3, rtol=2e-3), (out, ref)

    print("KERNEL_OK")
</pallas_src>

<mosaic_0001>
module attributes {stable_mosaic.version = 11 : i64} {
  func.func @attn_conditioned_kernel(%arg0: i32, %arg1: memref<8x256xf32, #tpu.memory_space<vmem>>, %arg2: memref<257x456xf32, #tpu.memory_space<vmem>>, %arg3: memref<456x104xf32, #tpu.memory_space<vmem>>, %arg4: memref<105x16xf32, #tpu.memory_space<vmem>>, %arg5: memref<8x16xf32, #tpu.memory_space<vmem>>, %arg6: memref<17x4xf32, #tpu.memory_space<vmem>>, %arg7: memref<8x4xf32, #tpu.memory_space<vmem>>) attributes {dimension_semantics = [#tpu.dimension_semantics<parallel>], iteration_bounds = array<i64: 2>, scalar_prefetch = 0 : i64, scratch_operands = 0 : i64, tpu.core_type = #tpu.core_type<tc>, window_params = [{transform_indices = @transform_0, window_bounds = array<i64: 8, 256>}, {pipeline_mode = #tpu.pipeline_mode<synchronous>, transform_indices = @transform_1, window_bounds = array<i64: 257, 456>}, {pipeline_mode = #tpu.pipeline_mode<synchronous>, transform_indices = @transform_2, window_bounds = array<i64: 456, 104>}, {pipeline_mode = #tpu.pipeline_mode<synchronous>, transform_indices = @transform_3, window_bounds = array<i64: 105, 16>}, {transform_indices = @transform_4, window_bounds = array<i64: 8, 16>}, {pipeline_mode = #tpu.pipeline_mode<synchronous>, transform_indices = @transform_5, window_bounds = array<i64: 17, 4>}, {transform_indices = @transform_6, window_bounds = array<i64: 8, 4>}]} {
    %c0 = arith.constant 0 : index
    %c0_0 = arith.constant 0 : index
    %0 = vector.load %arg1[%c0, %c0_0] : memref<8x256xf32, #tpu.memory_space<vmem>>, vector<8x256xf32>
    %c0_1 = arith.constant 0 : index
    %c0_2 = arith.constant 0 : index
    %1 = vector.load %arg2[%c0_1, %c0_2] : memref<257x456xf32, #tpu.memory_space<vmem>>, vector<256x456xf32>
    %cst = arith.constant dense<0.000000e+00> : vector<8x456xf32>
    %2 = tpu.matmul %0, %1, %cst {dimension_numbers = #tpu.dot_dimension_numbers<[1], [0], [0], [1], [0, 0, 1, 1], [], []>} : vector<8x256xf32>, vector<256x456xf32>, vector<8x456xf32> -> vector<8x456xf32>
    %c256 = arith.constant 256 : index
    %c0_3 = arith.constant 0 : index
    %3 = vector.load %arg2[%c256, %c0_3] : memref<257x456xf32, #tpu.memory_space<vmem>>, vector<1x456xf32>
    %4 = vector.broadcast %3 : vector<1x456xf32> to vector<8x456xf32>
    %5 = arith.addf %2, %4 : vector<8x456xf32>
    %6 = arith.mulf %5, %5 : vector<8x456xf32>
    %c0_4 = arith.constant 0 : index
    %c0_5 = arith.constant 0 : index
    %7 = vector.load %arg3[%c0_4, %c0_5] : memref<456x104xf32, #tpu.memory_space<vmem>>, vector<456x104xf32>
    %cst_6 = arith.constant dense<0.000000e+00> : vector<8x104xf32>
    %8 = tpu.matmul %6, %7, %cst_6 {dimension_numbers = #tpu.dot_dimension_numbers<[1], [0], [0], [1], [0, 0, 1, 1], [], []>} : vector<8x456xf32>, vector<456x104xf32>, vector<8x104xf32> -> vector<8x104xf32>
    %9 = math.log %8 : vector<8x104xf32>
    %cst_7 = arith.constant 0.000000e+00 : f32
    %10 = vector.broadcast %cst_7 : f32 to vector<8x104xf32>
    %11 = arith.cmpf ogt, %9, %10 : vector<8x104xf32>
    %cst_8 = arith.constant 0.000000e+00 : f32
    %12 = vector.broadcast %cst_8 : f32 to vector<8x104xf32>
    %13 = arith.minimumf %9, %12 : vector<8x104xf32>
    %14 = math.exp %13 : vector<8x104xf32>
    %cst_9 = arith.constant 1.000000e+00 : f32
    %15 = vector.broadcast %cst_9 : f32 to vector<8x104xf32>
    %16 = arith.subf %14, %15 : vector<8x104xf32>
    %17 = arith.select %11, %9, %16 : vector<8x104xi1>, vector<8x104xf32>
    %c0_10 = arith.constant 0 : index
    %c0_11 = arith.constant 0 : index
    %18 = vector.load %arg4[%c0_10, %c0_11] : memref<105x16xf32, #tpu.memory_space<vmem>>, vector<104x16xf32>
    %cst_12 = arith.constant dense<0.000000e+00> : vector<8x16xf32>
    %19 = tpu.matmul %17, %18, %cst_12 {dimension_numbers = #tpu.dot_dimension_numbers<[1], [0], [0], [1], [0, 0, 1, 1], [], []>} : vector<8x104xf32>, vector<104x16xf32>, vector<8x16xf32> -> vector<8x16xf32>
    %c104 = arith.constant 104 : index
    %c0_13 = arith.constant 0 : index
    %20 = vector.load %arg4[%c104, %c0_13] : memref<105x16xf32, #tpu.memory_space<vmem>>, vector<1x16xf32>
    %21 = vector.broadcast %20 : vector<1x16xf32> to vector<8x16xf32>
    %22 = arith.addf %19, %21 : vector<8x16xf32>
    %c0_14 = arith.constant 0 : index
    %c0_15 = arith.constant 0 : index
    %23 = vector.load %arg5[%c0_14, %c0_15] : memref<8x16xf32, #tpu.memory_space<vmem>>, vector<8x16xf32>
    %cst_16 = arith.constant 0.000000e+00 : f32
    %24 = vector.broadcast %cst_16 : f32 to vector<8x16xf32>
    %25 = arith.subf %24, %23 : vector<8x16xf32>
    %26 = math.exp %25 : vector<8x16xf32>
    %cst_17 = arith.constant 1.000000e+00 : f32
    %27 = vector.broadcast %cst_17 : f32 to vector<8x16xf32>
    %28 = arith.addf %27, %26 : vector<8x16xf32>
    %29 = tpu.reciprocal %28 {approx = true} : vector<8x16xf32> -> vector<8x16xf32>
    %30 = arith.mulf %29, %22 : vector<8x16xf32>
    %cst_18 = arith.constant 0.000000e+00 : f32
    %31 = vector.broadcast %cst_18 : f32 to vector<8x16xf32>
    %32 = arith.cmpf ogt, %30, %31 : vector<8x16xf32>
    %cst_19 = arith.constant 0.000000e+00 : f32
    %33 = vector.broadcast %cst_19 : f32 to vector<8x16xf32>
    %34 = arith.minimumf %30, %33 : vector<8x16xf32>
    %35 = math.exp %34 : vector<8x16xf32>
    %cst_20 = arith.constant 1.000000e+00 : f32
    %36 = vector.broadcast %cst_20 : f32 to vector<8x16xf32>
    %37 = arith.subf %35, %36 : vector<8x16xf32>
    %38 = arith.select %32, %30, %37 : vector<8x16xi1>, vector<8x16xf32>
    %c0_21 = arith.constant 0 : index
    %c0_22 = arith.constant 0 : index
    %39 = vector.load %arg6[%c0_21, %c0_22] : memref<17x4xf32, #tpu.memory_space<vmem>>, vector<16x4xf32>
    %cst_23 = arith.constant dense<0.000000e+00> : vector<8x4xf32>
    %40 = tpu.matmul %38, %39, %cst_23 {dimension_numbers = #tpu.dot_dimension_numbers<[1], [0], [0], [1], [0, 0, 1, 1], [], []>} : vector<8x16xf32>, vector<16x4xf32>, vector<8x4xf32> -> vector<8x4xf32>
    %c16 = arith.constant 16 : index
    %c0_24 = arith.constant 0 : index
    %41 = vector.load %arg6[%c16, %c0_24] : memref<17x4xf32, #tpu.memory_space<vmem>>, vector<1x4xf32>
    %42 = vector.broadcast %41 : vector<1x4xf32> to vector<8x4xf32>
    %43 = arith.addf %40, %42 : vector<8x4xf32>
    %c0_25 = arith.constant 0 : index
    %c0_26 = arith.constant 0 : index
    %44 = vector.load %arg7[%c0_25, %c0_26] : memref<8x4xf32, #tpu.memory_space<vmem>>, vector<8x4xf32>
    tpu.vector_store %arg7[%c0_25, %c0_26], %43 {strides = array<i32>} : memref<8x4xf32, #tpu.memory_space<vmem>>, vector<8x4xf32>,
    return
  }
  func.func @transform_0(%arg0: i32) -> (i32, i32) {
    %c0_i32 = arith.constant 0 : i32
    %c0_i32_0 = arith.constant 0 : i32
    return %arg0, %c0_i32 : i32, i32
  }
  func.func @transform_1(%arg0: i32) -> (i32, i32) {
    %c0_i32 = arith.constant 0 : i32
    %c0_i32_0 = arith.constant 0 : i32
    %c0_i32_1 = arith.constant 0 : i32
    return %c0_i32, %c0_i32_0 : i32, i32
  }
  func.func @transform_2(%arg0: i32) -> (i32, i32) {
    %c0_i32 = arith.constant 0 : i32
    %c0_i32_0 = arith.constant 0 : i32
    %c0_i32_1 = arith.constant 0 : i32
    return %c0_i32, %c0_i32_0 : i32, i32
  }
  func.func @transform_3(%arg0: i32) -> (i32, i32) {
    %c0_i32 = arith.constant 0 : i32
    %c0_i32_0 = arith.constant 0 : i32
    %c0_i32_1 = arith.constant 0 : i32
    return %c0_i32, %c0_i32_0 : i32, i32
  }
  func.func @transform_4(%arg0: i32) -> (i32, i32) {
    %c0_i32 = arith.constant 0 : i32
    %c0_i32_0 = arith.constant 0 : i32
    return %arg0, %c0_i32 : i32, i32
  }
  func.func @transform_5(%arg0: i32) -> (i32, i32) {
    %c0_i32 = arith.constant 0 : i32
    %c0_i32_0 = arith.constant 0 : i32
    %c0_i32_1 = arith.constant 0 : i32
    return %c0_i32, %c0_i32_0 : i32, i32
  }
  func.func @transform_6(%arg0: i32) -> (i32, i32) {
    %c0_i32 = arith.constant 0 : i32
    %c0_i32_0 = arith.constant 0 : i32
    return %arg0, %c0_i32 : i32, i32
  }
}

</mosaic_0001>

<bundles_post_ra>
// kernel: tpu_custom_call.1
= control target key start
LH: loop header
LB: loop body
LE: loop exit
PB: predicated region body
PF: predicated region fallthrough
CT: control target
= control target key end

     0   :  { %11 = vsyncpa [#allocation3], 0  ;;  %s1496_s21 = smov 0   ;;  %s1810_s0 = inlined_call_operand.vmem [shape: f32[16,256], index: 0, kind: input, shape index: {}]   ;;  %s1811_s1 = inlined_call_operand.hbm [shape: f32[257,456], index: 1, kind: input, shape index: {}]   ;;  %s1812_s2 = inlined_call_operand.vmem [shape: f32[456,104], index: 2, kind: input, shape index: {}]   ;;  %s1813_s3 = inlined_call_operand.vmem [shape: f32[105,16], index: 3, kind: input, shape index: {}]   ;;  %s1814_s4 = inlined_call_operand.vmem [shape: f32[16,16], index: 4, kind: input, shape index: {}]   ;;  %s1815_s5 = inlined_call_operand.vmem [shape: f32[17,4], index: 5, kind: input, shape index: {}]   ;;  %s1816_s6 = inlined_call_operand.vmem [shape: f32[16,4], index: 6, kind: output, shape index: {}]  }
   0x1 LB: > { %s1502_s22 = sadd.s32 4294967295, %s1453_s21   ;;  %p1057_p0 = scmp.ge.s32.totalorder %s1453_s21, 1  ;;  %s1453_s21 = sphi %s1496_s21, %s17_s21  }
   0x2   : > { %p184_p1 = scmp.lt.s32.totalorder %s1453_s21, 3  ;;  %s1455_s23 = smov [#allocation2]  }
   0x3   : > { %s196_s24 = sshll.u32 %s1455_s23, 4  ;;  %p1817_p3 = scmp.eq.s32.totalorder %s1502_s22, 0  ;;  %s197_s24 = int_to_ptr.vmem [resolvable:$true] %s196_s24 }
   0x4   : > { %p1506_p2 = pnand %p1057_p0, %p184_p1  ;;  %s1415_s29 = scalar_lea.hbm %s1811_s1, 16896 }
   0x5   : > { %p1416_p6 = scmp.ne.s32.totalorder %s1811_s1, %s1415_s29  ;;  %p1422_p10 = scmp.lt.u32.totalorder %s1415_s29, %s1811_s1 }
   0x6   : > { %s1819_s25 = scalar_select %p1506_p2, 1, 0 }
   0x7   : > { %p1385_p4 = pneg %p1506_p2 }
   0x9   : > { %p1515_p5 = pnand %p1817_p3, %p1385_p4 }
   0xb   : > { %p1417_p7 = pneg %p1515_p5 }
   0xd   : > { %p1418_p8 = pnand %p1417_p7, %p1416_p6 }
   0xf   : > { %p1419_p9 = pneg %p1418_p8 }
  0x11   : > { %p1424_p11 = pnand %p1422_p10, %p1419_p9 }
  0x13   : > { %1427 = shalt.err (!%p1424_p11)
}
  0x14   : > { %s1428_s10 = scalar_lea.vmem %s197_s24, 16896  ;;  %p1436_p1 = scmp.lt.s32.totalorder %s197_s24, %s197_s24 }
  0x15   : > { %p1429_p12 = scmp.ne.s32.totalorder %s197_s24, %s1428_s10  ;;  %p1437_p4 = scmp.lt.s32.totalorder %s1428_s10, %s1428_s10 }
  0x17   : > { %p1431_p13 = pnand %p1429_p12, %p1417_p7  ;;  %p1438_p3 = por %p1437_p4, %p1436_p1 }
  0x19   : > { %p1432_p0 = pneg %p1431_p13 }
  0x1b   : > { %p1439_p2 = pnand %p1438_p3, %p1432_p0 }
  0x1d   : > { %1442 = shalt.err (!%p1439_p2)
}
  0x1e   : > { %s1456_s11 = smov 512   ;;  %s1457_s12 = smov 32  }
  0x1f   : > { %1388 = dma.hbm_to_vmem [thread:$0]  (!%p1515_p5), %s1811_s1, 16896, %s197_s24, [#allocation3], %s1456_s11, %s1456_s11, %s1457_s12  }
  0x20   : > { %p1821_p6 = scmp.ne.s32.totalorder %s1819_s25, 0 }
  0x21   : > { %p1822_p8 = scmp.eq.s32.totalorder (!%p1821_p6), %s1502_s22, 0 }
  0x22   : > { %236 = sbr.rel (%p1821_p6) target bundleno = 1025 (0x401), region = 44 }
  0x29   : > { %1448 = dma.done.wait (%p1822_p8), [#allocation3], 16896   ;;  %p1823_p7 = pmov %p1822_p8 }
  0x2a   : > { %v285_v0 = vld [vmem:[#allocation2 + $0x8] sm:$0xff]  ;;  %v287_v2 = vld [vmem:[#allocation2 + $0x18] sm:$0xff]  ;;  %v284_v5 = vld [vmem:[#allocation2] sm:$0xff]  ;;  %p269_p2 = scmp.lt.s32.totalorder %s1502_s22, 1  ;;  %vm638_vm0 = vcmask 588800   ;;  %vm1460_vm1 = vmmov 0  }
  0x2b   : > { %1450 = vsyncadd (%p1823_p7), [#allocation3], 4294950400  ;;  %v289_v1 = vld [vmem:[#allocation2 + $0x28] sm:$0xff]  ;;  %v291_v4 = vld [vmem:[#allocation2 + $0x38] sm:$0xff]  ;;  %vm808_vm2 = vcmask 850944   ;;  %vm902_vm4 = vcmask 130048  }
  0x2c   : > { %v1164_v3 = vpack.c.bf16 %v289_v1, %v285_v0  ;;  %v288_v6 = vld [vmem:[#allocation2 + $0x20] sm:$0xff]  ;;  %v1228_v7 = vpack.c.bf16 %v291_v4, %v287_v2  ;;  %v286_v9 = vld [vmem:[#allocation2 + $0x10] sm:$0xff]  ;;  %v293_v11 = vld [vmem:[#allocation2 + $0x48] sm:$0xff]  ;;  %s1825_s22 = smov (!%p269_p2, %s1502_s22), 1  ;;  %vm976_vm6 = vcmask 31744  }
  0x2d   : > { %v1166_v8 = vpack.c.bf16 %v288_v6, %v284_v5  ;;  %v290_v10 = vld [vmem:[#allocation2 + $0x30] sm:$0xff]  ;;  %v297_v13 = vld [vmem:[#allocation2 + $0x68] sm:$0xff]  ;;  %v295_v14 = vld [vmem:[#allocation2 + $0x58] sm:$0xff]  ;;  %s1075_s15 = sshll.u32 %s1825_s22, 4  ;;  %s1064_s9 = sshll.u32 %s1825_s22, 3 }
  0x2e   : > { %1165 = vmatprep.subr.bf16.mxu0 %v1164_v3  ;;  %v1230_v12 = vpack.c.bf16 %v290_v10, %v286_v9  ;;  %v299_v15 = vld [vmem:[#allocation2 + $0x78] sm:$0xff]  ;;  %1229 = vmatprep.subr.bf16.mxu1 %v1228_v7  ;;  %v1168_v16 = vpack.c.bf16 %v297_v13, %v293_v11  ;;  %v292_v18 = vld [vmem:[#allocation2 + $0x40] sm:$0xff]  ;;  %v294_v20 = vld [vmem:[#allocation2 + $0x50] sm:$0xff]  ;;  %s1551_s18 = scalar_lea.vmem %s1810_s0, %s1075_s15  ;;  %s277_s12 = scalar_lea.vmem %s1814_s4, %s1064_s9 }
  0x2f   : > { %1167 = vmatpush1.bf16.msra.mxu0 %v1166_v8  ;;  %v1232_v17 = vpack.c.bf16 %v299_v15, %v295_v14  ;;  %v296_v19 = vld [vmem:[#allocation2 + $0x60] sm:$0xff]  ;;  %v298_v22 = vld [vmem:[#allocation2 + $0x70] sm:$0xff]  ;;  %v301_v23 = vld [vmem:[#allocation2 + $0x88] sm:$0xff]  ;;  %s281_s19 = scalar_lea.vmem %s1816_s6, %s1064_s9 }
  0x30   : > { %1231 = vmatpush1.bf16.msra.mxu1 %v1230_v12  ;;  %v1170_v21 = vpack.c.bf16 %v296_v19, %v292_v18  ;;  %v305_v24 = vld [vmem:[#allocation2 + $0xa8] sm:$0xff]  ;;  %1169 = vmatprep.subr.bf16.mxu0 %v1168_v16  ;;  %v1234_v25 = vpack.c.bf16 %v298_v22, %v294_v20  ;;  %v303_v27 = vld [vmem:[#allocation2 + $0x98] sm:$0xff]  ;;  %v300_v29 = vld [vmem:[#allocation2 + $0x80] sm:$0xff] }
  0x31   : > { %1233 = vmatprep.subr.bf16.mxu1 %v1232_v17  ;;  %v1172_v26 = vpack.c.bf16 %v305_v24, %v301_v23  ;;  %v307_v28 = vld [vmem:[#allocation2 + $0xb8] sm:$0xff]  ;;  %v304_v31 = vld [vmem:[#allocation2 + $0xa0] sm:$0xff]  ;;  %v302_v32 = vld [vmem:[#allocation2 + $0x90] sm:$0xff] }
  0x32   : > { %v1236_v30 = vpack.c.bf16 %v307_v28, %v303_v27  ;;  %v306_v33 = vld [vmem:[#allocation2 + $0xb0] sm:$0xff]  ;;  %v1174_v34 = vpack.c.bf16 %v304_v31, %v300_v29  ;;  %v309_v35 = vld [vmem:[#allocation2 + $0xc8] sm:$0xff]  ;;  %v311_v37 = vld [vmem:[#allocation2 + $0xd8] sm:$0xff] }
  0x33   : > { %1171 = vmatpush1.bf16.msra.mxu0 %v1170_v21  ;;  %v313_v36 = vld [vmem:[#allocation2 + $0xe8] sm:$0xff]  ;;  %v1238_v38 = vpack.c.bf16 %v306_v33, %v302_v32  ;;  %v315_v40 = vld [vmem:[#allocation2 + $0xf8] sm:$0xff]  ;;  %v308_v41 = vld [vmem:[#allocation2 + $0xc0] sm:$0xff] }
  0x34   : > { %1235 = vmatpush1.bf16.msra.mxu1 %v1234_v25  ;;  %1173 = vmatprep.subr.bf16.mxu0 %v1172_v26  ;;  %v1176_v39 = vpack.c.bf16 %v313_v36, %v309_v35  ;;  %v312_v42 = vld [vmem:[#allocation2 + $0xe0] sm:$0xff]  ;;  %v1240_v43 = vpack.c.bf16 %v315_v40, %v311_v37  ;;  %v310_v44 = vld [vmem:[#allocation2 + $0xd0] sm:$0xff]  ;;  %v317_v46 = vld [vmem:[#allocation2 + $0x108] sm:$0xff] }
  0x35   : > { %1237 = vmatprep.subr.bf16.mxu1 %v1236_v30  ;;  %v314_v45 = vld [vmem:[#allocation2 + $0xf0] sm:$0xff]  ;;  %v321_v47 = vld [vmem:[#allocation2 + $0x128] sm:$0xff]  ;;  %v319_v48 = vld [vmem:[#allocation2 + $0x118] sm:$0xff]  ;;  %v1178_v50 = vpack.c.bf16 %v312_v42, %v308_v41 }
  0x36   : > { %v323_v49 = vld [vmem:[#allocation2 + $0x138] sm:$0xff]  ;;  %v1242_v51 = vpack.c.bf16 %v314_v45, %v310_v44  ;;  %v1180_v52 = vpack.c.bf16 %v321_v47, %v317_v46  ;;  %v316_v53 = vld [vmem:[#allocation2 + $0x100] sm:$0xff]  ;;  %v318_v55 = vld [vmem:[#allocation2 + $0x110] sm:$0xff] }
  0x37   : > { %1175 = vmatpush1.bf16.msra.mxu0 %v1174_v34  ;;  %v320_v54 = vld [vmem:[#allocation2 + $0x120] sm:$0xff]  ;;  %v1244_v56 = vpack.c.bf16 %v323_v49, %v319_v48  ;;  %v322_v57 = vld [vmem:[#allocation2 + $0x130] sm:$0xff]  ;;  %v325_v58 = vld [vmem:[#allocation2 + $0x148] sm:$0xff] }
  0x38   : > { %1239 = vmatpush1.bf16.msra.mxu1 %v1238_v38  ;;  %1177 = vmatprep.subr.bf16.mxu0 %v1176_v39  ;;  %v329_v59 = vld [vmem:[#allocation2 + $0x168] sm:$0xff]  ;;  %v327_v60 = vld [vmem:[#allocation2 + $0x158] sm:$0xff]  ;;  %v1182_v62 = vpack.c.bf16 %v320_v54, %v316_v53  ;;  %v1246_v63 = vpack.c.bf16 %v322_v57, %v318_v55  ;;  %v324_v1 = vld [vmem:[#allocation2 + $0x140] sm:$0xff] }
  0x39   : > { %1241 = vmatprep.subr.bf16.mxu1 %v1240_v43  ;;  %v331_v61 = vld [vmem:[#allocation2 + $0x178] sm:$0xff]  ;;  %v1184_v0 = vpack.c.bf16 %v329_v59, %v325_v58  ;;  %v328_v2 = vld [vmem:[#allocation2 + $0x160] sm:$0xff]  ;;  %v326_v3 = vld [vmem:[#allocation2 + $0x150] sm:$0xff] }
  0x3a   : > { %v1248_v4 = vpack.c.bf16 %v331_v61, %v327_v60  ;;  %v330_v5 = vld [vmem:[#allocation2 + $0x170] sm:$0xff]  ;;  %v333_v6 = vld [vmem:[#allocation2 + $0x188] sm:$0xff]  ;;  %v335_v8 = vld [vmem:[#allocation2 + $0x198] sm:$0xff]  ;;  %v1186_v10 = vpack.c.bf16 %v328_v2, %v324_v1 }
  0x3b   : > { %1179 = vmatpush1.bf16.msra.mxu0 %v1178_v50  ;;  %v337_v7 = vld [vmem:[#allocation2 + $0x1a8] sm:$0xff]  ;;  %v339_v9 = vld [vmem:[#allocation2 + $0x1b8] sm:$0xff]  ;;  %v1250_v11 = vpack.c.bf16 %v330_v5, %v326_v3  ;;  %v332_v13 = vld [vmem:[#allocation2 + $0x180] sm:$0xff] }
  0x3c   : > { %1243 = vmatpush1.bf16.msra.mxu1 %v1242_v51  ;;  %1181 = vmatprep.subr.bf16.mxu0 %v1180_v52  ;;  %v1188_v12 = vpack.c.bf16 %v337_v7, %v333_v6  ;;  %v336_v14 = vld [vmem:[#allocation2 + $0x1a0] sm:$0xff]  ;;  %v334_v15 = vld [vmem:[#allocation2 + $0x190] sm:$0xff]  ;;  %v1252_v16 = vpack.c.bf16 %v339_v9, %v335_v8  ;;  %v341_v18 = vld [vmem:[#allocation2 + $0x1c8] sm:$0xff] }
  0x3d   : > { %1245 = vmatprep.subr.bf16.mxu1 %v1244_v56  ;;  %v338_v17 = vld [vmem:[#allocation2 + $0x1b0] sm:$0xff]  ;;  %v345_v19 = vld [vmem:[#allocation2 + $0x1e8] sm:$0xff]  ;;  %v343_v20 = vld [vmem:[#allocation2 + $0x1d8] sm:$0xff]  ;;  %v1190_v22 = vpack.c.bf16 %v336_v14, %v332_v13 }
  0x3e   : > { %v347_v21 = vld [vmem:[#allocation2 + $0x1f8] sm:$0xff]  ;;  %v1254_v23 = vpack.c.bf16 %v338_v17, %v334_v15  ;;  %v1192_v24 = vpack.c.bf16 %v345_v19, %v341_v18  ;;  %v340_v25 = vld [vmem:[#allocation2 + $0x1c0] sm:$0xff]  ;;  %v342_v27 = vld [vmem:[#allocation2 + $0x1d0] sm:$0xff] }
  0x3f   : > { %1183 = vmatpush1.bf16.msra.mxu0 %v1182_v62  ;;  %v344_v26 = vld [vmem:[#allocation2 + $0x1e0] sm:$0xff]  ;;  %v1256_v28 = vpack.c.bf16 %v347_v21, %v343_v20  ;;  %v346_v29 = vld [vmem:[#allocation2 + $0x1f0] sm:$0xff]  ;;  %v349_v30 = vld [vmem:[#allocation2 + $0x208] sm:$0xff] }
  0x40   : > { %1247 = vmatpush1.bf16.msra.mxu1 %v1246_v63  ;;  %1185 = vmatprep.subr.bf16.mxu0 %v1184_v0  ;;  %v353_v31 = vld [vmem:[#allocation2 + $0x228] sm:$0xff]  ;;  %v351_v32 = vld [vmem:[#allocation2 + $0x218] sm:$0xff]  ;;  %v1194_v34 = vpack.c.bf16 %v344_v26, %v340_v25  ;;  %v1258_v35 = vpack.c.bf16 %v346_v29, %v342_v27  ;;  %v348_v37 = vld [vmem:[#allocation2 + $0x200] sm:$0xff] }
  0x41   : > { %1249 = vmatprep.subr.bf16.mxu1 %v1248_v4  ;;  %v355_v33 = vld [vmem:[#allocation2 + $0x238] sm:$0xff]  ;;  %v1196_v36 = vpack.c.bf16 %v353_v31, %v349_v30  ;;  %v352_v38 = vld [vmem:[#allocation2 + $0x220] sm:$0xff]  ;;  %v350_v39 = vld [vmem:[#allocation2 + $0x210] sm:$0xff] }
  0x42   : > { %v1260_v40 = vpack.c.bf16 %v355_v33, %v351_v32  ;;  %v354_v41 = vld [vmem:[#allocation2 + $0x230] sm:$0xff]  ;;  %v357_v42 = vld [vmem:[#allocation2 + $0x248] sm:$0xff]  ;;  %v359_v44 = vld [vmem:[#allocation2 + $0x258] sm:$0xff]  ;;  %v1198_v46 = vpack.c.bf16 %v352_v38, %v348_v37 }
  0x43   : > { %1187 = vmatpush1.bf16.msra.mxu0 %v1186_v10  ;;  %v361_v43 = vld [vmem:[#allocation2 + $0x268] sm:$0xff]  ;;  %v363_v45 = vld [vmem:[#allocation2 + $0x278] sm:$0xff]  ;;  %v1262_v47 = vpack.c.bf16 %v354_v41, %v350_v39  ;;  %v356_v49 = vld [vmem:[#allocation2 + $0x240] sm:$0xff] }
  0x44   : > { %1251 = vmatpush1.bf16.msra.mxu1 %v1250_v11  ;;  %1189 = vmatprep.subr.bf16.mxu0 %v1188_v12  ;;  %v1200_v48 = vpack.c.bf16 %v361_v43, %v357_v42  ;;  %v360_v50 = vld [vmem:[#allocation2 + $0x260] sm:$0xff]  ;;  %v358_v51 = vld [vmem:[#allocation2 + $0x250] sm:$0xff]  ;;  %v1264_v52 = vpack.c.bf16 %v363_v45, %v359_v44  ;;  %v365_v54 = vld [vmem:[#allocation2 + $0x288] sm:$0xff] }
  0x45   : > { %1253 = vmatprep.subr.bf16.mxu1 %v1252_v16  ;;  %v362_v53 = vld [vmem:[#allocation2 + $0x270] sm:$0xff]  ;;  %v369_v55 = vld [vmem:[#allocation2 + $0x2a8] sm:$0xff]  ;;  %v367_v56 = vld [vmem:[#allocation2 + $0x298] sm:$0xff]  ;;  %v1202_v58 = vpack.c.bf16 %v360_v50, %v356_v49 }
  0x46   : > { %v371_v57 = vld [vmem:[#allocation2 + $0x2b8] sm:$0xff]  ;;  %v1266_v59 = vpack.c.bf16 %v362_v53, %v358_v51  ;;  %v1204_v60 = vpack.c.bf16 %v369_v55, %v365_v54  ;;  %v364_v61 = vld [vmem:[#allocation2 + $0x280] sm:$0xff]  ;;  %v366_v63 = vld [vmem:[#allocation2 + $0x290] sm:$0xff] }
  0x47   : > { %1191 = vmatpush1.bf16.msra.mxu0 %v1190_v22  ;;  %v368_v62 = vld [vmem:[#allocation2 + $0x2a0] sm:$0xff]  ;;  %v1268_v0 = vpack.c.bf16 %v371_v57, %v367_v56  ;;  %v370_v1 = vld [vmem:[#allocation2 + $0x2b0] sm:$0xff]  ;;  %v373_v2 = vld [vmem:[#allocation2 + $0x2c8] sm:$0xff] }
  0x48   : > { %1255 = vmatpush1.bf16.msra.mxu1 %v1254_v23  ;;  %1193 = vmatprep.subr.bf16.mxu0 %v1192_v24  ;;  %v377_v3 = vld [vmem:[#allocation2 + $0x2e8] sm:$0xff]  ;;  %v375_v4 = vld [vmem:[#allocation2 + $0x2d8] sm:$0xff]  ;;  %v1206_v6 = vpack.c.bf16 %v368_v62, %v364_v61  ;;  %v372_v7 = vld [vmem:[#allocation2 + $0x2c0] sm:$0xff]  ;;  %v1270_v8 = vpack.c.bf16 %v370_v1, %v366_v63 }
  0x49   : > { %1257 = vmatprep.subr.bf16.mxu1 %v1256_v28  ;;  %v379_v5 = vld [vmem:[#allocation2 + $0x2f8] sm:$0xff]  ;;  %v1208_v9 = vpack.c.bf16 %v377_v3, %v373_v2  ;;  %v376_v10 = vld [vmem:[#allocation2 + $0x2e0] sm:$0xff]  ;;  %v374_v11 = vld [vmem:[#allocation2 + $0x2d0] sm:$0xff] }
  0x4a   : > { %v378_v12 = vld [vmem:[#allocation2 + $0x2f0] sm:$0xff]  ;;  %v1272_v13 = vpack.c.bf16 %v379_v5, %v375_v4  ;;  %v381_v14 = vld [vmem:[#allocation2 + $0x308] sm:$0xff]  ;;  %v383_v17 = vld [vmem:[#allocation2 + $0x318] sm:$0xff]  ;;  %v1210_v19 = vpack.c.bf16 %v376_v10, %v372_v7 }
  0x4b   : > { %1195 = vmatpush1.bf16.msra.mxu0 %v1194_v34  ;;  %v385_v15 = vld [vmem:[#allocation2 + $0x328] sm:$0xff]  ;;  %v387_v18 = vld [vmem:[#allocation2 + $0x338] sm:$0xff]  ;;  %v1274_v20 = vpack.c.bf16 %v378_v12, %v374_v11  ;;  %v380_v22 = vld [vmem:[#allocation2 + $0x300] sm:$0xff] }
  0x4c   : > { %1259 = vmatpush1.bf16.msra.mxu1 %v1258_v35  ;;  %1197 = vmatprep.subr.bf16.mxu0 %v1196_v36  ;;  %v283_v16 = vld [vmem:[%s1551_s18 + $0x8] sm:$0xff]  ;;  %v1212_v21 = vpack.c.bf16 %v385_v15, %v381_v14  ;;  %v384_v23 = vld [vmem:[#allocation2 + $0x320] sm:$0xff]  ;;  %v382_v24 = vld [vmem:[#allocation2 + $0x310] sm:$0xff]  ;;  %v1276_v25 = vpack.c.bf16 %v387_v18, %v383_v17  ;;  %v1458_v17 = vmov 0.0|0.0  }
  0x4d   : > { %1261 = vmatprep.subr.bf16.mxu1 %v1260_v40  ;;  %499 = vmatprep.mubr.f32.mxu0 %v283_v16  ;;  %v386_v26 = vld [vmem:[#allocation2 + $0x330] sm:$0xff]  ;;  %v389_v27 = vld [vmem:[#allocation2 + $0x348] sm:$0xff]  ;;  %v391_v29 = vld [vmem:[#allocation2 + $0x358] sm:$0xff]  ;;  %v1214_v31 = vpack.c.bf16 %v384_v23, %v380_v22 }
  0x4e   : > { %570 = vmatprep.mubr.f32.mxu1 %v283_v16  ;;  %v393_v28 = vld [vmem:[#allocation2 + $0x368] sm:$0xff]  ;;  %v395_v30 = vld [vmem:[#allocation2 + $0x378] sm:$0xff]  ;;  %v1278_v32 = vpack.c.bf16 %v386_v26, %v382_v24  ;;  %v388_v34 = vld [vmem:[#allocation2 + $0x340] sm:$0xff] }
  0x4f   : > { %1199 = vmatpush1.bf16.msra.mxu0 %v1198_v46  ;;  %v1216_v33 = vpack.c.bf16 %v393_v28, %v389_v27  ;;  %v392_v35 = vld [vmem:[#allocation2 + $0x360] sm:$0xff]  ;;  %v390_v36 = vld [vmem:[#allocation2 + $0x350] sm:$0xff]  ;;  %v1280_v37 = vpack.c.bf16 %v395_v30, %v391_v29  ;;  %v397_v39 = vld [vmem:[#allocation2 + $0x388] sm:$0xff] }
  0x50   : > { %1263 = vmatpush1.bf16.msra.mxu1 %v1262_v47  ;;  %1201 = vmatprep.subr.bf16.mxu0 %v1200_v48  ;;  %v394_v38 = vld [vmem:[#allocation2 + $0x370] sm:$0xff]  ;;  %v401_v40 = vld [vmem:[#allocation2 + $0x3a8] sm:$0xff]  ;;  %v399_v41 = vld [vmem:[#allocation2 + $0x398] sm:$0xff]  ;;  %v1218_v43 = vpack.c.bf16 %v392_v35, %v388_v34 }
  0x51   : > { %1265 = vmatprep.subr.bf16.mxu1 %v1264_v52  ;;  %v403_v42 = vld [vmem:[#allocation2 + $0x3b8] sm:$0xff]  ;;  %v1282_v44 = vpack.c.bf16 %v394_v38, %v390_v36  ;;  %v1220_v45 = vpack.c.bf16 %v401_v40, %v397_v39  ;;  %v396_v46 = vld [vmem:[#allocation2 + $0x380] sm:$0xff]  ;;  %v398_v48 = vld [vmem:[#allocation2 + $0x390] sm:$0xff] }
  0x52   : > { %v400_v47 = vld [vmem:[#allocation2 + $0x3a0] sm:$0xff]  ;;  %v1284_v49 = vpack.c.bf16 %v403_v42, %v399_v41  ;;  %v402_v50 = vld [vmem:[#allocation2 + $0x3b0] sm:$0xff]  ;;  %v405_v51 = vld [vmem:[#allocation2 + $0x3c8] sm:$0xff] }
  0x53   : > { %1203 = vmatpush1.bf16.msra.mxu0 %v1202_v58  ;;  %v409_v52 = vld [vmem:[#allocation2 + $0x3e8] sm:$0xff]  ;;  %v407_v53 = vld [vmem:[#allocation2 + $0x3d8] sm:$0xff]  ;;  %v1222_v55 = vpack.c.bf16 %v400_v47, %v396_v46  ;;  %v1286_v56 = vpack.c.bf16 %v402_v50, %v398_v48  ;;  %v404_v58 = vld [vmem:[#allocation2 + $0x3c0] sm:$0xff] }
  0x54   : > { %1267 = vmatpush1.bf16.msra.mxu1 %v1266_v59  ;;  %1205 = vmatprep.subr.bf16.mxu0 %v1204_v60  ;;  %v411_v54 = vld [vmem:[#allocation2 + $0x3f8] sm:$0xff]  ;;  %v1224_v57 = vpack.c.bf16 %v409_v52, %v405_v51  ;;  %v408_v59 = vld [vmem:[#allocation2 + $0x3e0] sm:$0xff]  ;;  %v406_v60 = vld [vmem:[#allocation2 + $0x3d0] sm:$0xff] }
  0x55   : > { %1269 = vmatprep.subr.bf16.mxu1 %v1268_v0  ;;  %v1288_v61 = vpack.c.bf16 %v411_v54, %v407_v53  ;;  %v410_v62 = vld [vmem:[#allocation2 + $0x3f0] sm:$0xff]  ;;  %v597_v63 = vld [vmem:[%s1812_s2 + $0x80] sm:$0xff]  ;;  %v598_v0 = vld [vmem:[%s1812_s2 + $0x88] sm:$0xff]  ;;  %v1226_v1 = vpack.c.bf16 %v408_v59, %v404_v58 }
  0x56   : > { %v1290_v2 = vpack.c.bf16 %v410_v62, %v406_v60  ;;  %v613_v3 = vld [vmem:[%s1812_s2 + $0x100] sm:$0xff]  ;;  %v1292_v4 = vpack.c.bf16 %v598_v0, %v597_v63  ;;  %v614_v7 = vld [vmem:[%s1812_s2 + $0x108] sm:$0xff]  ;;  %v583_v15 = vld [vmem:[%s1812_s2 + $0x10] sm:$0xff] }
  0x57   : > { %1207 = vmatpush1.bf16.msra.mxu0 %v1206_v6  ;;  %v581_v5 = vld [vmem:[%s1812_s2] sm:$0xff]  ;;  %v582_v6 = vld [vmem:[%s1812_s2 + $0x8] sm:$0xff]  ;;  %v1325_v12 = vpack.c.bf16 %v614_v7, %v613_v3  ;;  %v584_v16 = vld [vmem:[%s1812_s2 + $0x18] sm:$0xff] }
  0x58   : > { %1271 = vmatpush1.bf16.msra.mxu1 %v1270_v8  ;;  %1209 = vmatprep.subr.bf16.mxu0 %v1208_v9  ;;  %v599_v8 = vld [vmem:[%s1812_s2 + $0x90] sm:$0xff]  ;;  %v600_v9 = vld [vmem:[%s1812_s2 + $0x98] sm:$0xff]  ;;  %v282_v10 = vld [vmem:[%s1551_s18] sm:$0xff]  ;;  %v1294_v11 = vpack.c.bf16 %v582_v6, %v581_v5 }
  0x59   : > { %1273 = vmatprep.subr.bf16.mxu1 %v1272_v13  ;;  %v615_v13 = vld [vmem:[%s1812_s2 + $0x110] sm:$0xff]  ;;  %v1296_v14 = vpack.c.bf16 %v600_v9, %v599_v8  ;;  %v616_v18 = vld [vmem:[%s1812_s2 + $0x118] sm:$0xff]  ;;  %v617_v23 = vld [vmem:[%s1812_s2 + $0x120] sm:$0xff] }
  0x5a   : > { %v1328_v22 = vpack.c.bf16 %v616_v18, %v615_v13  ;;  %v586_v26 = vld [vmem:[%s1812_s2 + $0x28] sm:$0xff]  ;;  %v603_v28 = vld [vmem:[%s1812_s2 + $0xb0] sm:$0xff]  ;;  %v604_v29 = vld [vmem:[%s1812_s2 + $0xb8] sm:$0xff] }
  0x5b   : > { %1211 = vmatpush1.bf16.msra.mxu0 %v1210_v19  ;;  %v601_v19 = vld [vmem:[%s1812_s2 + $0xa0] sm:$0xff]  ;;  %v618_v27 = vld [vmem:[%s1812_s2 + $0x128] sm:$0xff]  ;;  %v587_v34 = vld [vmem:[%s1812_s2 + $0x30] sm:$0xff] }
  0x5c   : > { %1275 = vmatpush1.bf16.msra.mxu1 %v1274_v20  ;;  %1213 = vmatprep.subr.bf16.mxu0 %v1212_v21  ;;  %v602_v20 = vld [vmem:[%s1812_s2 + $0xa8] sm:$0xff]  ;;  %v1298_v21 = vpack.c.bf16 %v584_v16, %v583_v15  ;;  %v588_v35 = vld [vmem:[%s1812_s2 + $0x38] sm:$0xff]  ;;  %v621_v41 = vld [vmem:[%s1812_s2 + $0x140] sm:$0xff] }
  0x5d   : > { %1277 = vmatprep.subr.bf16.mxu1 %v1276_v25  ;;  %v1300_v24 = vpack.c.bf16 %v602_v20, %v601_v19  ;;  %v585_v25 = vld [vmem:[%s1812_s2 + $0x20] sm:$0xff]  ;;  %v620_v36 = vld [vmem:[%s1812_s2 + $0x138] sm:$0xff]  ;;  %v606_v38 = vld [vmem:[%s1812_s2 + $0xc8] sm:$0xff]  ;;  %v1306_v39 = vpack.c.bf16 %v588_v35, %v587_v34 }
  0x5e   : > { %v1302_v30 = vpack.c.bf16 %v586_v26, %v585_v25  ;;  %v607_v46 = vld [vmem:[%s1812_s2 + $0xd0] sm:$0xff]  ;;  %v608_v47 = vld [vmem:[%s1812_s2 + $0xd8] sm:$0xff]  ;;  %v625_v60 = vld [vmem:[%s1812_s2 + $0x160] sm:$0xff]  ;;  %v415_v26 = vlaneseq }
  0x5f   : > { %1215 = vmatpush1.bf16.msra.mxu0 %v1214_v31  ;;  %v1331_v31 = vpack.c.bf16 %v618_v27, %v617_v23  ;;  %v623_v50 = vld [vmem:[%s1812_s2 + $0x150] sm:$0xff]  ;;  %v1312_v51 = vpack.c.bf16 %v608_v47, %v607_v46  ;;  %v592_v53 = vld [vmem:[%s1812_s2 + $0x58] sm:$0xff]  ;;  %v630_v3 = vld [vmem:[%s1812_s2 + $0x188] sm:$0xff] }
  0x60   : > { %1279 = vmatpush1.bf16.msra.mxu1 %v1278_v32  ;;  %1217 = vmatprep.subr.bf16.mxu0 %v1216_v33  ;;  %v619_v32 = vld [vmem:[%s1812_s2 + $0x130] sm:$0xff]  ;;  %v1304_v33 = vpack.c.bf16 %v604_v29, %v603_v28  ;;  %v624_v54 = vld [vmem:[%s1812_s2 + $0x158] sm:$0xff]  ;;  %v633_v8 = vld [vmem:[%s1812_s2 + $0x1a0] sm:$0xff]  ;;  %v416_v27 = vshrl.u32 %v415_v26, 7 }
  0x61   : > { %1281 = vmatprep.subr.bf16.mxu1 %v1280_v37  ;;  %v605_v37 = vld [vmem:[%s1812_s2 + $0xc0] sm:$0xff]  ;;  %v1334_v40 = vpack.c.bf16 %v620_v36, %v619_v32  ;;  %v591_v52 = vld [vmem:[%s1812_s2 + $0x50] sm:$0xff]  ;;  %v1340_v58 = vpack.c.bf16 %v624_v54, %v623_v50  ;;  %v628_v0 = vld [vmem:[%s1812_s2 + $0x178] sm:$0xff] }
  0x62   : > { %v1308_v42 = vpack.c.bf16 %v606_v38, %v605_v37  ;;  %v627_v63 = vld [vmem:[%s1812_s2 + $0x170] sm:$0xff]  ;;  %v632_v6 = vld [vmem:[%s1812_s2 + $0x198] sm:$0xff]  ;;  %v634_v9 = vld [vmem:[%s1812_s2 + $0x1a8] sm:$0xff]  ;;  %v417_v28 = vsub.s32 0, %v416_v27  ;;  %v429_v32 = vsub.s32 3, %v416_v27 }
  0x63   : > { %1219 = vmatpush1.bf16.msra.mxu0 %v1218_v43  ;;  %v589_v43 = vld [vmem:[%s1812_s2 + $0x40] sm:$0xff]  ;;  %v631_v5 = vld [vmem:[%s1812_s2 + $0x190] sm:$0xff]  ;;  %v636_v15 = vld [vmem:[%s1812_s2 + $0x1b8] sm:$0xff] }
  0x64   : > { %1283 = vmatpush1.bf16.msra.mxu1 %v1282_v44  ;;  %1221 = vmatprep.subr.bf16.mxu0 %v1220_v45  ;;  %v590_v44 = vld [vmem:[%s1812_s2 + $0x48] sm:$0xff]  ;;  %v1352_v7 = vpack.c.bf16 %v632_v6, %v631_v5  ;;  %v611_v18 = vld [vmem:[%s1812_s2 + $0xf0] sm:$0xff]  ;;  %v612_v19 = vld [vmem:[%s1812_s2 + $0xf8] sm:$0xff] }
  0x65   : > { %1285 = vmatprep.subr.bf16.mxu1 %v1284_v49  ;;  %v622_v45 = vld [vmem:[%s1812_s2 + $0x148] sm:$0xff]  ;;  %v1310_v48 = vpack.c.bf16 %v590_v44, %v589_v43  ;;  %v1320_v20 = vpack.c.bf16 %v612_v19, %v611_v18  ;;  %v637_v25 = vld [vmem:[%s1812_s2 + $0x1c0] sm:$0xff] }
  0x66   : > { %v1337_v49 = vpack.c.bf16 %v622_v45, %v621_v41  ;;  %v413_v29 = vld [vmem:[#allocation2 + $0x400] ss:$8 sm:$0xf] }
  0x67   : > { %1223 = vmatpush1.bf16.msra.mxu0 %v1222_v55  ;;  %v609_v55 = vld [vmem:[%s1812_s2 + $0xe0] sm:$0xff]  ;;  %v430_v36 = vrot.slane %v413_v29, %v429_v32  ;;  %v791_v50 = vld [vmem:[%s1813_s3 + $0x8] sm:$0xff] }
  0x68   : > { %1287 = vmatpush1.bf16.msra.mxu1 %v1286_v56  ;;  %1225 = vmatprep.subr.bf16.mxu0 %v1224_v57  ;;  %v610_v56 = vld [vmem:[%s1812_s2 + $0xe8] sm:$0xff]  ;;  %v1314_v57 = vpack.c.bf16 %v592_v53, %v591_v52  ;;  %v792_v52 = vld [vmem:[%s1813_s3 + $0x10] sm:$0xff]  ;;  %v793_v53 = vld [vmem:[%s1813_s3 + $0x18] sm:$0xff] }
  0x69   : > { %1289 = vmatprep.subr.bf16.mxu1 %v1288_v61  ;;  %v1316_v59 = vpack.c.bf16 %v610_v56, %v609_v55  ;;  %v626_v61 = vld [vmem:[%s1812_s2 + $0x168] sm:$0xff]  ;;  %v1364_v54 = vpack.c.bf16 %v793_v53, %v792_v52  ;;  %v794_v55 = vld [vmem:[%s1813_s3 + $0x20] sm:$0xff] }
  0x6a   : > { %v1343_v62 = vpack.c.bf16 %v626_v61, %v625_v60  ;;  %v795_v56 = vld [vmem:[%s1813_s3 + $0x28] sm:$0xff]  ;;  %v798_v61 = vld [vmem:[%s1813_s3 + $0x40] sm:$0xff] }
  0x6b   : > { %1227 = vmatpush1.bf16.msra.mxu0 %v1226_v1  ;;  %v1346_v1 = vpack.c.bf16 %v628_v0, %v627_v63  ;;  %v800_v0 = vld [vmem:[%s1813_s3 + $0x50] sm:$0xff]  ;;  %v896_v18 = vld [vmem:[%s1815_s5 + $0x8] sm:$0xff] }
  0x6c   : > { %1291 = vmatpush1.bf16.msra.mxu1 %v1290_v2  ;;  %1293 = vmatprep.subr.bf16.mxu0 %v1292_v4  ;;  %v629_v2 = vld [vmem:[%s1812_s2 + $0x180] sm:$0xff] }
  0x6d   : > { %1324 = vmatprep.subr.bf16.mxu1 %v1458_v17  ;;  %v1349_v4 = vpack.c.bf16 %v630_v3, %v629_v2  ;;  %v802_v3 = vld [vmem:[%s1813_s3 + $0x60] sm:$0xff] }
  0x6e   : > { %500 = vmatmul.mubr.f32.vlgmr.msra.gmra.mrb[0].mxu0 %v282_v10 }
  0x6f   : > { %571 = vmatmul.mubr.f32.vlgmr.msra.gmra.mrb[0].mxu1 %v282_v10  ;;  %1295 = vmatpush3.bf16.msra.mxu0 %v1294_v11  ;;  %v1355_v10 = vpack.c.bf16 %v634_v9, %v633_v8  ;;  %v593_v11 = vld [vmem:[%s1812_s2 + $0x60] sm:$0xff] }
  0x70   : > { %1326 = vmatpush1.bf16.msra.mxu1 %v1325_v12  ;;  %1297 = vmatprep.subr.bf16.mxu0 %v1296_v14  ;;  %v594_v12 = vld [vmem:[%s1812_s2 + $0x68] sm:$0xff]  ;;  %v635_v14 = vld [vmem:[%s1812_s2 + $0x1b0] sm:$0xff] }
  0x71   : > { %1327 = vmatprep.subr.bf16.mxu1 %v1458_v17  ;;  %v1318_v13 = vpack.c.bf16 %v594_v12, %v593_v11  ;;  %v1358_v16 = vpack.c.bf16 %v636_v15, %v635_v14 }
  0x73   : > { %1299 = vmatpush3.bf16.msra.mxu0 %v1298_v21  ;;  %v595_v21 = vld [vmem:[%s1812_s2 + $0x70] sm:$0xff] }
  0x74   : > { %1329 = vmatpush1.bf16.msra.mxu1 %v1328_v22  ;;  %1301 = vmatprep.subr.bf16.mxu0 %v1300_v24  ;;  %v596_v22 = vld [vmem:[%s1812_s2 + $0x78] sm:$0xff]  ;;  %v1459_v24 = vmov 0.0  }
  0x75   : > { %1330 = vmatprep.subr.bf16.mxu1 %v1458_v17  ;;  %v1322_v23 = vpack.c.bf16 %v596_v22, %v595_v21 }
  0x77   : > { %1303 = vmatpush3.bf16.msra.mxu0 %v1302_v30  ;;  %v425_v30 = vsub.s32 2, %v416_v27 }
  0x78   : > { %1332 = vmatpush1.bf16.msra.mxu1 %v1331_v31  ;;  %1305 = vmatprep.subr.bf16.mxu0 %v1304_v33  ;;  %v421_v31 = vsub.s32 1, %v416_v27  ;;  %v418_v33 = vrot.slane %v413_v29, %v417_v28 }
  0x79   : > { %1333 = vmatprep.subr.bf16.mxu1 %v1458_v17  ;;  %v426_v34 = vrot.slane %v413_v29, %v425_v30 }
  0x7a   : > { %v422_v35 = vrot.slane %v413_v29, %v421_v31 }
  0x7b   : > { %1307 = vmatpush3.bf16.msra.mxu0 %v1306_v39 }
  0x7c   : > { %1335 = vmatpush1.bf16.msra.mxu1 %v1334_v40  ;;  %1309 = vmatprep.subr.bf16.mxu0 %v1308_v42 }
  0x7d   : > { %1336 = vmatprep.subr.bf16.mxu1 %v1458_v17 }
  0x7f   : > { %1311 = vmatpush3.bf16.msra.mxu0 %v1310_v48 }
  0x80   : > { %1338 = vmatpush1.bf16.msra.mxu1 %v1337_v49  ;;  %1313 = vmatprep.subr.bf16.mxu0 %v1312_v51  ;;  %v790_v49 = vld [vmem:[%s1813_s3] sm:$0xff] }
  0x81   : > { %1339 = vmatprep.subr.bf16.mxu1 %v1458_v17  ;;  %v1361_v51 = vpack.c.bf16 %v791_v50, %v790_v49 }
  0x83   : > { %1315 = vmatpush3.bf16.msra.mxu0 %v1314_v57  ;;  %v1367_v57 = vpack.c.bf16 %v795_v56, %v794_v55 }
  0x84   : > { %1341 = vmatpush1.bf16.msra.mxu1 %v1340_v58  ;;  %1317 = vmatprep.subr.bf16.mxu0 %v1316_v59  ;;  %v796_v58 = vld [vmem:[%s1813_s3 + $0x30] sm:$0xff]  ;;  %v797_v59 = vld [vmem:[%s1813_s3 + $0x38] sm:$0xff] }
  0x85   : > { %1342 = vmatprep.subr.bf16.mxu1 %v1458_v17  ;;  %v1370_v60 = vpack.c.bf16 %v797_v59, %v796_v58 }
  0x87   : > { %1319 = vmatpush3.bf16.msra.mxu0 %v1318_v13 }
  0x88   : > { %1344 = vmatpush1.bf16.msra.mxu1 %v1343_v62  ;;  %1321 = vmatprep.subr.bf16.mxu0 %v1320_v20  ;;  %v799_v62 = vld [vmem:[%s1813_s3 + $0x48] sm:$0xff]  ;;  %v882_v20 = vld [vmem:[%s277_s12] sm:$0xff] }
  0x89   : > { %1345 = vmatprep.subr.bf16.mxu1 %v1458_v17  ;;  %v1373_v63 = vpack.c.bf16 %v799_v62, %v798_v61  ;;  %v883_v21 = vsub.f32 0.0, %v882_v20 }
  0x8b   : > { %1323 = vmatpush3.bf16.msra.mxu0 %v1322_v23  ;;  %v884_v22 = vmul.f32 1.442695, %v883_v21 }
  0x8c   : > { %1347 = vmatpush1.bf16.msra.mxu1 %v1346_v1  ;;  %1360 = vmatprep.subr.bf16.mxu0 %v1458_v17  ;;  %v801_v1 = vld [vmem:[%s1813_s3 + $0x58] sm:$0xff] }
  0x8d   : > { %1348 = vmatprep.subr.bf16.mxu1 %v1458_v17  ;;  %v1376_v2 = vpack.c.bf16 %v801_v1, %v800_v0 }
  0x90   : > { %1350 = vmatpush1.bf16.msra.mxu1 %v1349_v4 }
  0x91   : > { %1351 = vmatprep.subr.bf16.mxu1 %v1458_v17 }
  0x94   : > { %1353 = vmatpush1.bf16.msra.mxu1 %v1352_v7 }
  0x95   : > { %1354 = vmatprep.subr.bf16.mxu1 %v1458_v17 }
  0x98   : > { %1356 = vmatpush1.bf16.msra.mxu1 %v1355_v10 }
  0x99   : > { %1357 = vmatprep.subr.bf16.mxu1 %v1458_v17 }
  0x9c   : > { %1359 = vmatpush1.bf16.msra.mxu1 %v1358_v16  ;;  %v895_v16 = vld [vmem:[%s1815_s5] sm:$0xff] }
  0x9d   : > { %760 = vmatprep.subr.mxu1 %v1459_v24  ;;  %v1379_v19 = vpack.c.bf16 %v896_v18, %v895_v16 }
  0xa0   : > { %761 = vmatpush1.msra.mxu1 %v637_v25  ;;  %v1068_v25 = vld [vmem:[%s1813_s3 + $0x68] ss:$0 sm:$0xff] }
  0xa1   : > { %1378 = vmatprep.subr.bf16.mxu1 %v1458_v17 }
 0x141   : > { %v501_v37 = vpop.f32.mrb[0].mxu0 }
 0x142   : > { %v502_v38 = vadd.f32 %v501_v37, %v418_v33  ;;  %v572_v39 = vpop.f32.mrb[0].mxu1  ;;  %v503_v40 = vpop.f32.mrb[1].mxu0 }
 0x143   : > { %v573_v41 = vadd.f32 %v572_v39, %v426_v34  ;;  %v504_v42 = vadd.f32 %v503_v40, %v422_v35  ;;  %v574_v43 = vpop.f32.mrb[1].mxu1 }
 0x144   : > { %v575_v44 = vadd.f32 %v574_v43, %v430_v36  ;;  %v577_v47 = vmul.f32 %v502_v38, %v502_v38  ;;  %v1071_v36 = vld [vmem:[%s1815_s5 + $0x10] ss:$0 sm:$0xff] }
 0x145   : > { %v579_v45 = vmul.f32 %v573_v41, %v573_v41  ;;  %v578_v46 = vmul.f32 %v504_v42, %v504_v42 }
 0x146   : > { %v580_v48 = vmul.f32 %v575_v44, %v575_v44 }
 0x147   : > { %706 = vmatprep.mubr.f32.mxu0 %v578_v46 }
 0x148   : > { %1066 = vmatprep.mubr.msk.f32.mxu1 %vm638_vm0, %v580_v48  ;;  %707 = vmatmul.mubr.f32.vlgmr.msra.gmra.mrb[2].mxu0 %v577_v47 }
 0x149   : > { %777 = vmatmul.mubr.f32.vlgmr.msra.gmra.mrb[2].mxu1 %v579_v45  ;;  %1362 = vmatpush3.bf16.msra.mxu0 %v1361_v51 }
 0x14a   : > { %1363 = vmatprep.subr.bf16.mxu0 %v1458_v17  ;;  %1154 = vmatprep.mubr.msk.f32.mxu0 %vm1460_vm1, %v1459_v24 }
 0x14b   : > { %1161 = vmatprep.mubr.msk.f32.mxu1 %vm1460_vm1, %v1459_v24  ;;  %1380 = vmatpush3.bf16.msra.mxu1 %v1379_v19 }
 0x14d   : > { %1365 = vmatpush3.bf16.msra.mxu0 %v1364_v54 }
 0x14e   : > { %1366 = vmatprep.subr.bf16.mxu0 %v1458_v17 }
 0x151   : > { %1368 = vmatpush3.bf16.msra.mxu0 %v1367_v57 }
 0x152   : > { %1369 = vmatprep.subr.bf16.mxu0 %v1458_v17 }
 0x155   : > { %1371 = vmatpush3.bf16.msra.mxu0 %v1370_v60 }
 0x156   : > { %1372 = vmatprep.subr.bf16.mxu0 %v1458_v17 }
 0x159   : > { %1374 = vmatpush3.bf16.msra.mxu0 %v1373_v63 }
 0x15a   : > { %1375 = vmatprep.subr.bf16.mxu0 %v1458_v17 }
 0x15d   : > { %1377 = vmatpush3.bf16.msra.mxu0 %v1376_v2 }
 0x15e   : > { %1152 = vmatprep.subr.mxu0 %v1459_v24 }
 0x161   : > { %1153 = vmatpush3.msra.mxu0 %v802_v3 }
 0x21b   : > { %v1108_v4 = vpop.f32.mrb[2].mxu0 }
 0x21c   : > { %v778_v5 = vpop.f32.mrb[2].mxu1  ;;  %v1109_v6 = vpop.f32.mrb[3].mxu0 }
 0x21d   : > { %v1110_v7 = vadd.f32 %v1109_v6, %v1108_v4  ;;  %v780_v8 = vpop.f32.mrb[3].mxu1 }
 0x21f   : > { %v779_v9 = vadd.f32 %v1110_v7, %v778_v5 }
 0x221   : > { %1405 = vlog2.f32 %v779_v9 }
 0x22b   : > { %v1406_v10 = vpop.eup %1405 }
 0x22c   : > { %v783_v11 = vmul.f32 0.6931472, %v1406_v10 }
 0x22e   : > { %v785_v12 = vmin.f32 %v783_v11, 0.0  ;;  %vm784_vm3 = vcmp.gt.f32.partialorder %v783_v11, 0.0 }
 0x230   : > { %v786_v17 = vmul.f32 1.442695, %v785_v12 }
 0x232   : > { %1407 = vpow2.f32 %v786_v17 }
 0x233   : > { %1409 = vpow2.f32 %v884_v22 }
 0x23c   : > { %v1408_v13 = vpop.eup %1407 }
 0x23d   : > { %v1067_v14 = vadd.f32 -1.0, %v1408_v13  ;;  %v1410_v23 = vpop.eup %1409 }
 0x23e   : > { %v886_v24 = vadd.f32 1.0, %v1410_v23 }
 0x23f   : > { %v789_v15 = vsel %vm784_vm3, %v783_v11, %v1067_v14 }
 0x240   : > { %1155 = vmatmul.mubr.msk.f32.vlgmr.msra.gmra.mrb[4].mxu0 %vm808_vm2, %v789_v15  ;;  %1411 = vrcp.f32 %v886_v24 }
 0x24a   : > { %v1412_v26 = vpop.eup %1411 }
 0x313   : > { %v878_v27 = vpop.f32.mrb[4].mxu0 }
 0x314   : > { %v879_v28 = vadd.f32 %v1068_v25, %v878_v27  ;;  %v1156_v29 = vpop.f32.mrb[5].mxu0 }
 0x316   : > { %v888_v30 = vmul.f32 %v1412_v26, %v879_v28 }
 0x318   : > { %v890_v31 = vmin.f32 %v888_v30, 0.0  ;;  %vm889_vm5 = vcmp.gt.f32.partialorder %v888_v30, 0.0 }
 0x31a   : > { %v891_v32 = vmul.f32 1.442695, %v890_v31 }
 0x31c   : > { %1413 = vpow2.f32 %v891_v32 }
 0x326   : > { %v1414_v33 = vpop.eup %1413 }
 0x327   : > { %v1070_v34 = vadd.f32 -1.0, %v1414_v33 }
 0x329   : > { %v894_v35 = vsel %vm889_vm5, %v888_v30, %v1070_v34 }
 0x32a   : > { %1162 = vmatmul.mubr.msk.f32.vlgmr.msra.gmra.mrb[4].mxu1 %vm902_vm4, %v894_v35 }
 0x3fd   : > { %v972_v37 = vpop.f32.mrb[4].mxu1 }
 0x3fe   : > { %v973_v38 = vadd.f32 %v1071_v36, %v972_v37  ;;  %v1163_v39 = vpop.f32.mrb[5].mxu1 }
 0x400   : > { %977 = vst.msk [vmem:[%s281_s19] sm:$0xff] %vm976_vm6, %v973_v38 }
 0x401 PF: > { %s17_s21 = sadd.s32 1, %s1453_s21  }
 0x402   : > { %p14_p3 = scmp.ge.s32.totalorder %s17_s21, 4  }
 0x404   :  { %16 = sbr.rel (!%p14_p3) target bundleno = 1 (0x1), region = 83 }
 0x40b   :  { %997 = vsyncpa [#allocation3], 1 }
 0x40c   :  { %999 = vsyncpa [#allocation3 + $0x1], 1 }

</bundles_post_ra>
